<compile_context>
chip_gen: v7x
topology: tpu7x:2x2x1
jax: 0.10.0
libtpu: 0.0.40
codegen_flags: <defaults>
</compile_context>

<pallas_src>
import functools

import jax
import jax.numpy as jnp
from jax import lax
from jax.experimental import pallas as pl
from jax.experimental.pallas import tpu as pltpu


_LANE = 128      # lane width / Cout tile (v5e-safe; bump to 256 on v6e/v7x)
_SUBLANE = 8     # sublane granularity used to pad Wo
_TARGET_M = 128  # target rows (= TH * Wo_pad) of each per-step matmul


def _round_up(x, m):
    return (x + m - 1) // m * m


def _conv_kernel(x_ref, w_ref, o_ref, *, th, wo_pad, stride, kh, kw, cin):
    """One (batch, row-tile, cout-tile) step of the convolution.

    x_ref: (1, Hp_ext, Wp_ext, Cin)   full padded image (bf16, VMEM)
    w_ref: (KH, KW, Cin, CT)          Cout tile of the weights (bf16, VMEM)
    o_ref: (1, TH*Wo_pad, CT)         lane-dense output tile (f32, VMEM)
    """
    ct = o_ref.shape[-1]
    th_in = (th - 1) * stride + kh

    t = pl.program_id(1)
    row0 = t * (th * stride)
    # Rows [row0, row0 + th_in) of the padded image feed this output row tile.
    xt = x_ref[0, pl.ds(row0, th_in), :, :]            # (th_in, Wp_ext, Cin)

    acc = jnp.zeros((th * wo_pad, ct), dtype=jnp.float32)
    for ih in range(kh):
        for iw in range(kw):
            patch = lax.slice(
                xt,
                (ih, iw, 0),
                (ih + stride * (th - 1) + 1,
                 iw + stride * (wo_pad - 1) + 1,
                 cin),
                (stride, stride, 1))                   # (th, wo_pad, cin)
            # wo_pad % 8 == 0 -> this flatten is a pure re-tiling, no relayout.
            patch2d = patch.reshape(th * wo_pad, cin)
            acc = acc + jnp.dot(patch2d, w_ref[ih, iw],
                                preferred_element_type=jnp.float32)

    o_ref[0, :, :] = acc


def conv_forward(x_nchw, weight_oihw, *, stride=1, padding=0, groups=1):
    """Forward pass of Conv (bias-free Conv2d). NCHW in / NCHW out (f32)."""
    if groups != 1:
        # TODO(synk): depthwise / grouped conv not implemented.
        raise NotImplementedError("groups > 1 not supported")
    n, cin, h, w = x_nchw.shape
    cout, cin_w, kh, kw = weight_oihw.shape
    assert cin_w == cin

    ho = (h + 2 * padding - kh) // stride + 1
    wo = (w + 2 * padding - kw) // stride + 1

    # ---- tiling -------------------------------------------------------------
    wo_pad = _round_up(wo, _SUBLANE)                 # relayout-free flatten
    th = min(ho, max(1, _TARGET_M // wo_pad))        # output rows per grid step
    ho_pad = _round_up(ho, th)
    n_row_tiles = ho_pad // th
    cout_pad = _round_up(cout, _LANE)
    ct = min(cout_pad, _LANE)                        # lane-dense Cout tile
    n_cout_tiles = cout_pad // ct

    hp_ext = (ho_pad - 1) * stride + kh              # input extent actually read
    wp_ext = (wo_pad - 1) * stride + kw

    # ---- layout plumbing (plain JAX; fused by XLA) ---------------------------
    x = jnp.transpose(x_nchw, (0, 2, 3, 1)).astype(jnp.bfloat16)       # NHWC
    x = jnp.pad(x, ((0, 0),
                    (padding, max(0, hp_ext - h - padding)),
                    (padding, max(0, wp_ext - w - padding)),
                    (0, 0)))
    x = x[:, :hp_ext, :wp_ext, :]

    wgt = jnp.transpose(weight_oihw, (2, 3, 1, 0)).astype(jnp.bfloat16)  # HWIO
    wgt = jnp.pad(wgt, ((0, 0), (0, 0), (0, 0), (0, cout_pad - cout)))

    kernel = functools.partial(_conv_kernel, th=th, wo_pad=wo_pad,
                               stride=stride, kh=kh, kw=kw, cin=cin)

    out = pl.pallas_call(
        kernel,
        out_shape=jax.ShapeDtypeStruct((n, ho_pad * wo_pad, cout_pad),
                                       jnp.float32),
        grid_spec=pltpu.PrefetchScalarGridSpec(
            num_scalar_prefetch=0,
            grid=(n, n_row_tiles, n_cout_tiles),
            in_specs=[
                pl.BlockSpec((1, hp_ext, wp_ext, cin),
                             lambda b, t, c: (b, 0, 0, 0)),
                pl.BlockSpec((kh, kw, cin, ct),
                             lambda b, t, c: (0, 0, 0, c)),
            ],
            out_specs=pl.BlockSpec((1, th * wo_pad, ct),
                                   lambda b, t, c: (b, t, c)),
        ),
        compiler_params=pltpu.CompilerParams(
            dimension_semantics=("parallel", "parallel", "parallel"),
            vmem_limit_bytes=32 * 1024 * 1024),
    )(x, wgt)

    # strip the Ho/Wo/Cout alignment padding and go back to NCHW
    out = out.reshape(n, ho_pad, wo_pad, cout_pad)[:, :ho, :wo, :cout]
    return jnp.transpose(out, (0, 3, 1, 2))


if __name__ == "__main__":
    # Module config: Conv(inp=4, oup=8, kernel=3, stride=1, padding=0)
    inp, oup, kernel, stride, padding = 4, 8, 3, 1, 0
    batch, hw = 2, 16

    key = jax.random.PRNGKey(0)
    kx, kw_ = jax.random.split(key)
    x = jax.random.normal(kx, (batch, inp, hw, hw), dtype=jnp.float32)
    weight = jax.random.normal(kw_, (oup, inp, kernel, kernel),
                               dtype=jnp.float32) * 0.1

    out = conv_forward(x, weight, stride=stride, padding=padding)
    out = jax.block_until_ready(out)

    # Reference with the same bf16 input quantization / f32 accumulation.
    ref = lax.conv_general_dilated(
        x.astype(jnp.bfloat16), weight.astype(jnp.bfloat16),
        window_strides=(stride, stride),
        padding=[(padding, padding), (padding, padding)],
        dimension_numbers=("NCHW", "OIHW", "NCHW"),
        preferred_element_type=jnp.float32)

    assert out.shape == ref.shape == (batch, oup, hw - kernel + 1, hw - kernel + 1)
    assert jnp.allclose(out, ref, atol=1e-3, rtol=1e-3), float(
        jnp.max(jnp.abs(out - ref)))

    print("KERNEL_OK")
</pallas_src>

<mosaic_0001>
module attributes {stable_mosaic.version = 11 : i64} {
  func.func @_conv_kernel(%arg0: i32, %arg1: i32, %arg2: i32, %arg3: memref<1x18x18x4xbf16, #tpu.memory_space<vmem>>, %arg4: memref<3x3x4x128xbf16, #tpu.memory_space<vmem>>, %arg5: memref<1x128x128xf32, #tpu.memory_space<vmem>>) attributes {dimension_semantics = [#tpu.dimension_semantics<parallel>, #tpu.dimension_semantics<parallel>, #tpu.dimension_semantics<parallel>], iteration_bounds = array<i64: 2, 2, 1>, scalar_prefetch = 0 : i64, scratch_operands = 0 : i64, tpu.core_type = #tpu.core_type<tc>, window_params = [{transform_indices = @transform_0, window_bounds = array<i64: 1, 18, 18, 4>}, {transform_indices = @transform_1, window_bounds = array<i64: 3, 3, 4, 128>}, {transform_indices = @transform_2, window_bounds = array<i64: 1, 128, 128>}]} {
    %c8_i32 = arith.constant 8 : i32
    %0 = arith.muli %arg1, %c8_i32 : i32
    %c0 = arith.constant 0 : index
    %1 = arith.index_cast %0 : i32 to index
    %c0_0 = arith.constant 0 : index
    %c0_1 = arith.constant 0 : index
    %2 = vector.load %arg3[%c0, %1, %c0_0, %c0_1] : memref<1x18x18x4xbf16, #tpu.memory_space<vmem>>, vector<1x10x18x4xbf16>
    %3 = vector.shape_cast %2 : vector<1x10x18x4xbf16> to vector<10x18x4xbf16>
    %cst = arith.constant 0.000000e+00 : f32
    %4 = vector.broadcast %cst : f32 to vector<128x128xf32>
    %5 = vector.extract_strided_slice %3 {offsets = [0, 0, 0], sizes = [8, 16, 4], strides = [1, 1, 1]} : vector<10x18x4xbf16> to vector<8x16x4xbf16>
    %6 = vector.shape_cast %5 : vector<8x16x4xbf16> to vector<128x4xbf16>
    %c0_2 = arith.constant 0 : index
    %c0_3 = arith.constant 0 : index
    %c0_4 = arith.constant 0 : index
    %c0_5 = arith.constant 0 : index
    %7 = vector.load %arg4[%c0_2, %c0_3, %c0_4, %c0_5] : memref<3x3x4x128xbf16, #tpu.memory_space<vmem>>, vector<1x1x4x128xbf16>
    %8 = vector.shape_cast %7 : vector<1x1x4x128xbf16> to vector<4x128xbf16>
    %cst_6 = arith.constant dense<0.000000e+00> : vector<128x128xf32>
    %9 = tpu.matmul %6, %8, %cst_6 {dimension_numbers = #tpu.dot_dimension_numbers<[1], [0], [0], [1], [0, 0, 1, 1], [], []>} : vector<128x4xbf16>, vector<4x128xbf16>, vector<128x128xf32> -> vector<128x128xf32>
    %10 = arith.addf %4, %9 : vector<128x128xf32>
    %11 = vector.extract_strided_slice %3 {offsets = [0, 1, 0], sizes = [8, 16, 4], strides = [1, 1, 1]} : vector<10x18x4xbf16> to vector<8x16x4xbf16>
    %12 = vector.shape_cast %11 : vector<8x16x4xbf16> to vector<128x4xbf16>
    %c0_7 = arith.constant 0 : index
    %c1 = arith.constant 1 : index
    %c0_8 = arith.constant 0 : index
    %c0_9 = arith.constant 0 : index
    %13 = vector.load %arg4[%c0_7, %c1, %c0_8, %c0_9] : memref<3x3x4x128xbf16, #tpu.memory_space<vmem>>, vector<1x1x4x128xbf16>
    %14 = vector.shape_cast %13 : vector<1x1x4x128xbf16> to vector<4x128xbf16>
    %cst_10 = arith.constant dense<0.000000e+00> : vector<128x128xf32>
    %15 = tpu.matmul %12, %14, %cst_10 {dimension_numbers = #tpu.dot_dimension_numbers<[1], [0], [0], [1], [0, 0, 1, 1], [], []>} : vector<128x4xbf16>, vector<4x128xbf16>, vector<128x128xf32> -> vector<128x128xf32>
    %16 = arith.addf %10, %15 : vector<128x128xf32>
    %17 = vector.extract_strided_slice %3 {offsets = [0, 2, 0], sizes = [8, 16, 4], strides = [1, 1, 1]} : vector<10x18x4xbf16> to vector<8x16x4xbf16>
    %18 = vector.shape_cast %17 : vector<8x16x4xbf16> to vector<128x4xbf16>
    %c0_11 = arith.constant 0 : index
    %c2 = arith.constant 2 : index
    %c0_12 = arith.constant 0 : index
    %c0_13 = arith.constant 0 : index
    %19 = vector.load %arg4[%c0_11, %c2, %c0_12, %c0_13] : memref<3x3x4x128xbf16, #tpu.memory_space<vmem>>, vector<1x1x4x128xbf16>
    %20 = vector.shape_cast %19 : vector<1x1x4x128xbf16> to vector<4x128xbf16>
    %cst_14 = arith.constant dense<0.000000e+00> : vector<128x128xf32>
    %21 = tpu.matmul %18, %20, %cst_14 {dimension_numbers = #tpu.dot_dimension_numbers<[1], [0], [0], [1], [0, 0, 1, 1], [], []>} : vector<128x4xbf16>, vector<4x128xbf16>, vector<128x128xf32> -> vector<128x128xf32>
    %22 = arith.addf %16, %21 : vector<128x128xf32>
    %23 = vector.extract_strided_slice %3 {offsets = [1, 0, 0], sizes = [8, 16, 4], strides = [1, 1, 1]} : vector<10x18x4xbf16> to vector<8x16x4xbf16>
    %24 = vector.shape_cast %23 : vector<8x16x4xbf16> to vector<128x4xbf16>
    %c1_15 = arith.constant 1 : index
    %c0_16 = arith.constant 0 : index
    %c0_17 = arith.constant 0 : index
    %c0_18 = arith.constant 0 : index
    %25 = vector.load %arg4[%c1_15, %c0_16, %c0_17, %c0_18] : memref<3x3x4x128xbf16, #tpu.memory_space<vmem>>, vector<1x1x4x128xbf16>
    %26 = vector.shape_cast %25 : vector<1x1x4x128xbf16> to vector<4x128xbf16>
    %cst_19 = arith.constant dense<0.000000e+00> : vector<128x128xf32>
    %27 = tpu.matmul %24, %26, %cst_19 {dimension_numbers = #tpu.dot_dimension_numbers<[1], [0], [0], [1], [0, 0, 1, 1], [], []>} : vector<128x4xbf16>, vector<4x128xbf16>, vector<128x128xf32> -> vector<128x128xf32>
    %28 = arith.addf %22, %27 : vector<128x128xf32>
    %29 = vector.extract_strided_slice %3 {offsets = [1, 1, 0], sizes = [8, 16, 4], strides = [1, 1, 1]} : vector<10x18x4xbf16> to vector<8x16x4xbf16>
    %30 = vector.shape_cast %29 : vector<8x16x4xbf16> to vector<128x4xbf16>
    %c1_20 = arith.constant 1 : index
    %c1_21 = arith.constant 1 : index
    %c0_22 = arith.constant 0 : index
    %c0_23 = arith.constant 0 : index
    %31 = vector.load %arg4[%c1_20, %c1_21, %c0_22, %c0_23] : memref<3x3x4x128xbf16, #tpu.memory_space<vmem>>, vector<1x1x4x128xbf16>
    %32 = vector.shape_cast %31 : vector<1x1x4x128xbf16> to vector<4x128xbf16>
    %cst_24 = arith.constant dense<0.000000e+00> : vector<128x128xf32>
    %33 = tpu.matmul %30, %32, %cst_24 {dimension_numbers = #tpu.dot_dimension_numbers<[1], [0], [0], [1], [0, 0, 1, 1], [], []>} : vector<128x4xbf16>, vector<4x128xbf16>, vector<128x128xf32> -> vector<128x128xf32>
    %34 = arith.addf %28, %33 : vector<128x128xf32>
    %35 = vector.extract_strided_slice %3 {offsets = [1, 2, 0], sizes = [8, 16, 4], strides = [1, 1, 1]} : vector<10x18x4xbf16> to vector<8x16x4xbf16>
    %36 = vector.shape_cast %35 : vector<8x16x4xbf16> to vector<128x4xbf16>
    %c1_25 = arith.constant 1 : index
    %c2_26 = arith.constant 2 : index
    %c0_27 = arith.constant 0 : index
    %c0_28 = arith.constant 0 : index
    %37 = vector.load %arg4[%c1_25, %c2_26, %c0_27, %c0_28] : memref<3x3x4x128xbf16, #tpu.memory_space<vmem>>, vector<1x1x4x128xbf16>
    %38 = vector.shape_cast %37 : vector<1x1x4x128xbf16> to vector<4x128xbf16>
    %cst_29 = arith.constant dense<0.000000e+00> : vector<128x128xf32>
    %39 = tpu.matmul %36, %38, %cst_29 {dimension_numbers = #tpu.dot_dimension_numbers<[1], [0], [0], [1], [0, 0, 1, 1], [], []>} : vector<128x4xbf16>, vector<4x128xbf16>, vector<128x128xf32> -> vector<128x128xf32>
    %40 = arith.addf %34, %39 : vector<128x128xf32>
    %41 = vector.extract_strided_slice %3 {offsets = [2, 0, 0], sizes = [8, 16, 4], strides = [1, 1, 1]} : vector<10x18x4xbf16> to vector<8x16x4xbf16>
    %42 = vector.shape_cast %41 : vector<8x16x4xbf16> to vector<128x4xbf16>
    %c2_30 = arith.constant 2 : index
    %c0_31 = arith.constant 0 : index
    %c0_32 = arith.constant 0 : index
    %c0_33 = arith.constant 0 : index
    %43 = vector.load %arg4[%c2_30, %c0_31, %c0_32, %c0_33] : memref<3x3x4x128xbf16, #tpu.memory_space<vmem>>, vector<1x1x4x128xbf16>
    %44 = vector.shape_cast %43 : vector<1x1x4x128xbf16> to vector<4x128xbf16>
    %cst_34 = arith.constant dense<0.000000e+00> : vector<128x128xf32>
    %45 = tpu.matmul %42, %44, %cst_34 {dimension_numbers = #tpu.dot_dimension_numbers<[1], [0], [0], [1], [0, 0, 1, 1], [], []>} : vector<128x4xbf16>, vector<4x128xbf16>, vector<128x128xf32> -> vector<128x128xf32>
    %46 = arith.addf %40, %45 : vector<128x128xf32>
    %47 = vector.extract_strided_slice %3 {offsets = [2, 1, 0], sizes = [8, 16, 4], strides = [1, 1, 1]} : vector<10x18x4xbf16> to vector<8x16x4xbf16>
    %48 = vector.shape_cast %47 : vector<8x16x4xbf16> to vector<128x4xbf16>
    %c2_35 = arith.constant 2 : index
    %c1_36 = arith.constant 1 : index
    %c0_37 = arith.constant 0 : index
    %c0_38 = arith.constant 0 : index
    %49 = vector.load %arg4[%c2_35, %c1_36, %c0_37, %c0_38] : memref<3x3x4x128xbf16, #tpu.memory_space<vmem>>, vector<1x1x4x128xbf16>
    %50 = vector.shape_cast %49 : vector<1x1x4x128xbf16> to vector<4x128xbf16>
    %cst_39 = arith.constant dense<0.000000e+00> : vector<128x128xf32>
    %51 = tpu.matmul %48, %50, %cst_39 {dimension_numbers = #tpu.dot_dimension_numbers<[1], [0], [0], [1], [0, 0, 1, 1], [], []>} : vector<128x4xbf16>, vector<4x128xbf16>, vector<128x128xf32> -> vector<128x128xf32>
    %52 = arith.addf %46, %51 : vector<128x128xf32>
    %53 = vector.extract_strided_slice %3 {offsets = [2, 2, 0], sizes = [8, 16, 4], strides = [1, 1, 1]} : vector<10x18x4xbf16> to vector<8x16x4xbf16>
    %54 = vector.shape_cast %53 : vector<8x16x4xbf16> to vector<128x4xbf16>
    %c2_40 = arith.constant 2 : index
    %c2_41 = arith.constant 2 : index
    %c0_42 = arith.constant 0 : index
    %c0_43 = arith.constant 0 : index
    %55 = vector.load %arg4[%c2_40, %c2_41, %c0_42, %c0_43] : memref<3x3x4x128xbf16, #tpu.memory_space<vmem>>, vector<1x1x4x128xbf16>
    %56 = vector.shape_cast %55 : vector<1x1x4x128xbf16> to vector<4x128xbf16>
    %cst_44 = arith.constant dense<0.000000e+00> : vector<128x128xf32>
    %57 = tpu.matmul %54, %56, %cst_44 {dimension_numbers = #tpu.dot_dimension_numbers<[1], [0], [0], [1], [0, 0, 1, 1], [], []>} : vector<128x4xbf16>, vector<4x128xbf16>, vector<128x128xf32> -> vector<128x128xf32>
    %58 = arith.addf %52, %57 : vector<128x128xf32>
    %c0_45 = arith.constant 0 : index
    %c0_46 = arith.constant 0 : index
    %c0_47 = arith.constant 0 : index
    %59 = vector.load %arg5[%c0_45, %c0_46, %c0_47] : memref<1x128x128xf32, #tpu.memory_space<vmem>>, vector<1x128x128xf32>
    %60 = vector.shape_cast %59 : vector<1x128x128xf32> to vector<128x128xf32>
    %61 = vector.shape_cast %58 : vector<128x128xf32> to vector<1x128x128xf32>
    tpu.vector_store %arg5[%c0_45, %c0_46, %c0_47], %61 {strides = array<i32>} : memref<1x128x128xf32, #tpu.memory_space<vmem>>, vector<1x128x128xf32>,
    return
  }
  func.func @transform_0(%arg0: i32, %arg1: i32, %arg2: i32) -> (i32, i32, i32, i32) {
    %c0_i32 = arith.constant 0 : i32
    %c0_i32_0 = arith.constant 0 : i32
    %c0_i32_1 = arith.constant 0 : i32
    %c0_i32_2 = arith.constant 0 : i32
    return %arg0, %c0_i32, %c0_i32_0, %c0_i32_1 : i32, i32, i32, i32
  }
  func.func @transform_1(%arg0: i32, %arg1: i32, %arg2: i32) -> (i32, i32, i32, i32) {
    %c0_i32 = arith.constant 0 : i32
    %c0_i32_0 = arith.constant 0 : i32
    %c0_i32_1 = arith.constant 0 : i32
    %c0_i32_2 = arith.constant 0 : i32
    return %c0_i32, %c0_i32_0, %c0_i32_1, %arg2 : i32, i32, i32, i32
  }
  func.func @transform_2(%arg0: i32, %arg1: i32, %arg2: i32) -> (i32, i32, i32) {
    %c0_i32 = arith.constant 0 : i32
    return %arg0, %arg1, %arg2 : i32, i32, i32
  }
}

</mosaic_0001>

<bundles_post_ra>
// kernel: tpu_custom_call.1
= control target key start
LH: loop header
LB: loop body
LE: loop exit
PB: predicated region body
PF: predicated region fallthrough
CT: control target
= control target key end

     0   :  { %7 = vsyncpa [#allocation3], 0  ;;  %s3328_s0 = inlined_call_operand.vmem [shape: bf16[2,18,18,4], index: 0, kind: input, shape index: {}]   ;;  %s3329_s1 = inlined_call_operand.vmem [shape: bf16[3,3,4,128], index: 1, kind: input, shape index: {}]   ;;  %s3330_s2 = inlined_call_operand.hbm [shape: f32[2,256,128], index: 2, kind: output, shape index: {}]  }
   0x1   :  { %9 = vsyncpa [#allocation3 + $0x1], 0  ;;  %s2624_s9 = smov 0   ;;  %s2626_s10 = smov 0  }
   0x2   :  { %s2628_s11 = smov 0   ;;  %s2630_s12 = smov 0  }
   0x3   :  { %s2632_s13 = smov 0   ;;  %s2634_s14 = smov 0  }
   0x4   :  { %s2636_s15 = smov 0   ;;  %s2638_s16 = smov 0  }
   0x5 LB: > { %s1905_s17 = sadd.s32 4294967295, %s2604_s16   ;;  %s1906_s18 = sadd.s32 4294967294, %s2604_s16   ;;  %s2604_s16 = sphi %s2638_s16, %s15_s16   ;;  %s2600_s15 = sphi %s2636_s15, %s3343_s15   ;;  %s2596_s14 = sphi %s2634_s14, %s3342_s14   ;;  %s2592_s13 = sphi %s2632_s13, %s3341_s13   ;;  %s2588_s12 = sphi %s2630_s12, %s3340_s12   ;;  %s2584_s11 = sphi %s2628_s11, %s3339_s11   ;;  %s2580_s10 = sphi %s2626_s10, %s3338_s10   ;;  %s2576_s9 = sphi %s2624_s9, %s3337_s9  }
   0x6   : > { %s30_s19 = sadd.s32 1, %s2596_s14  ;;  %s34_s20 = sadd.s32 1, %s2600_s15 }
   0x7   : > { %p32_p0 = scmp.ge.s32.totalorder %s30_s19, 2  ;;  %p107_p1 = scmp.ne.s32.totalorder %s2584_s11, %s2580_s10 }
   0x8   : > { %p108_p2 = scmp.eq.s32.totalorder %s1905_s17, 3  ;;  %p113_p5 = scmp.ne.s32.totalorder %s2580_s10, %s2576_s9 }
   0x9   : > { %s3345_s19 = smov (%p32_p0, %s30_s19), 0  ;;  %s3347_s20 = smov (!%p32_p0, %s34_s20), %s2600_s15 }
   0xa   : > { %s91_s21 = ssub.s32 %s2596_s14, %s3345_s19  ;;  %p2675_p3 = por %p108_p2, %p107_p1 }
   0xb   : > { %p36_p4 = scmp.ge.s32.totalorder %s3347_s20, 2  ;;  %p114_p6 = scmp.eq.s32.totalorder %s1906_s18, 3 }
   0xc   : > { %p1910_p7 = scmp.ge.s32.totalorder %s2604_s16, 1  ;;  %p147_p9 = scmp.lt.s32.totalorder %s2604_s16, 5 }
   0xd   : > { %s3349_s20 = smov (%p36_p4, %s3347_s20), 0  ;;  %p2684_p8 = por %p114_p6, %p113_p5 }
   0xe   : > { %s90_s24 = ssub.s32 %s2600_s15, %s3349_s20  ;;  %s97_s25 = sadd.s32 1, %s2584_s11 }
   0xf   : > { %s92_s26 = sor.u32 %s91_s21, %s90_s24  ;;  %p148_p10 = pnand %p1910_p7, %p147_p9 }
  0x10   : > { %p95_p11 = scmp.eq.s32.totalorder %s92_s26, 0  ;;  %v1916_v0 = vld [vmem:[%s3329_s1 + $0x2] sm:$0x3] (!%p148_p10)  ;;  %vm465_vm0 = vcmask (!%p148_p10), 1041408   ;;  %v2701_v1 = vld [vmem:[%s3329_s1 + $0x8] sm:$0x3] (!%p148_p10) }
  0x11   : > { %151 = sbr.rel (%p148_p10) target bundleno = 421 (0x1a5), region = 28  ;;  %p173_p12 = scmp.lt.s32.totalorder (!%p148_p10), %s2592_s13, 1  ;;  %2416 = vmatprep.subr.msk.bf16.mxu1 (!%p148_p10), %vm465_vm0, %v1916_v0  ;;  %2420 = vmatprep.subr.msk.bf16.mxu0 (!%p148_p10), %vm465_vm0, %v2701_v1  ;;  %v467_v2 = vsel (!%p148_p10), %vm465_vm0, %v1916_v0, 0  ;;  %v2710_v3 = vsel (!%p148_p10), %vm465_vm0, %v2701_v1, 0  ;;  %v218_v4 = vld [vmem:[%s3329_s1] sm:$0x3] (!%p148_p10) }
  0x12   : > { %s2693_s27 = scalar_select %p95_p11, %s2584_s11, %s97_s25  }
  0x13   : > { %2125 = vmatpush3.bf16.msra.mxu1 (!%p148_p10), %v467_v2  ;;  %2197 = vmatpush3.bf16.msra.mxu0 (!%p148_p10), %v2710_v3  ;;  %s2042_s7 = smul.u32 (!%p148_p10), 96, %s2588_s12  ;;  %v1995_v5 = vld [vmem:[%s3329_s1 + $0xa] sm:$0x3] (!%p148_p10)  ;;  %vm219_vm1 = vsmask.f32 (!%p148_p10), 3328  ;;  %v2729_v6 = vsel (!%p148_p10), %vm465_vm0, %v218_v4, 0 }
  0x14   : > { %2417 = vmatprep.subr.msk.bf16.mxu1 (!%p148_p10), %vm465_vm0, %v218_v4  ;;  %2422 = vmatprep.subr.msk.bf16.mxu0 (!%p148_p10), %vm465_vm0, %v1995_v5  ;;  %vm220_vm2 = vsmask.f32 (!%p148_p10), 7440  ;;  %vm440_vm3 = vcmask (!%p148_p10), 31744   ;;  %v2755_v18 = vsel (!%p148_p10), %vm465_vm0, %v1995_v5, 0  ;;  %v2760_v23 = vld [vmem:[%s3329_s1 + $0xc] sm:$0x3] (!%p148_p10) }
  0x15   : > { %vm2772_vm4 = vmor (!%p148_p10), %vm219_vm1, %vm220_vm2  ;;  %v2781_v38 = vsel (!%p148_p10), %vm465_vm0, %v2760_v23, 0  ;;  %vm738_vm5 = vcmask (!%p148_p10), 1042432   ;;  %vm739_vm6 = vcmask (!%p148_p10), 1046532   ;;  %s2606_s6 = smov (!%p148_p10), [#allocation2]  }
  0x16   : > { %vm2855_vm7 = vmor (!%p148_p10), %vm738_vm5, %vm739_vm6 }
  0x18   : > { %s174_s4 = scalar_select %p173_p12, %s2592_s13, 1 }
  0x1a   : > { %s2426_s18 = smul.u32 216, %s174_s4 }
  0x1c   : > { %s177_s25 = scalar_lea.vmem %s3328_s0, %s2426_s18  ;;  %s170_s18 = sand.u32 1, %s2580_s10  }
  0x1d   : > { %s2726_s26 = scalar_lea.vmem %s177_s25, %s2042_s7  ;;  %s1911_s21 = sshll.u32 %s170_s18, 7 }
  0x1e   : > { %v2732_v7 = vld [vmem:[%s2726_s26] sm:$0xf]  ;;  %v2735_v8 = vld [vmem:[%s2726_s26 + $0x4] sm:$0xf]  ;;  %v2738_v9 = vld [vmem:[%s2726_s26 + $0x8] sm:$0x1] }
  0x1f   : > { %v223_v10 = vshrl.u32 %v2732_v7, 16  ;;  %v226_v11 = vshll.u32 %v2732_v7, 16  ;;  %v232_v12 = vshll.u32 %v2735_v8, 16  ;;  %v236_v13 = vshrl.u32 %v2735_v8, 16  ;;  %v2745_v14 = vld [vmem:[%s2726_s26 + $0xc] sm:$0xf] }
  0x20   : > { %v242_v15 = vshll.u32 %v2738_v9, 16  ;;  %v2749_v16 = vld [vmem:[%s2726_s26 + $0x10] sm:$0xf]  ;;  %v2752_v17 = vld [vmem:[%s2726_s26 + $0x14] sm:$0x1]  ;;  %v247_v25 = vshrl.u32 %v2745_v14, 16 }
  0x21   : > { %v225_v19 = vrot.slane %v223_v10, 4  ;;  %v228_v20 = vrot.slane %v226_v11, 5  ;;  %v234_v21 = vrot.slane %v232_v12, 5  ;;  %v238_v22 = vrot.slane %v236_v13, 4  ;;  %v2768_v32 = vld [vmem:[%s2726_s26 + $0x18] sm:$0xf] }
  0x22   : > { %v244_v24 = vrot.slane %v242_v15, 5  ;;  %v250_v26 = vshll.u32 %v2745_v14, 16  ;;  %v256_v27 = vshll.u32 %v2749_v16, 16  ;;  %v260_v30 = vshrl.u32 %v2749_v16, 16  ;;  %v2777_v37 = vld [vmem:[%s2726_s26 + $0x1c] sm:$0xf] }
  0x23   : > { %v229_v28 = vor.u32 %v228_v20, %v225_v19  ;;  %v239_v29 = vor.u32 %v238_v22, %v234_v21  ;;  %v266_v31 = vshll.u32 %v2752_v17, 16  ;;  %v249_v34 = vrot.slane %v247_v25, 4  ;;  %v2785_v45 = vld [vmem:[%s2726_s26 + $0x20] sm:$0x1]  ;;  %v2795_v56 = vld [vmem:[%s2726_s26 + $0x24] sm:$0xf] }
  0x24   : > { %v252_v35 = vrot.slane %v250_v26, 5  ;;  %v258_v36 = vrot.slane %v256_v27, 5  ;;  %v262_v41 = vrot.slane %v260_v30, 4  ;;  %v753_v44 = vrot.slane %v2752_v17, 5  ;;  %v2800_v61 = vld [vmem:[%s2726_s26 + $0x28] sm:$0xf] }
  0x25   : > { %v230_v39 = vrot.slane %v229_v28, 4  ;;  %v240_v40 = vrot.slane %v239_v29, 4  ;;  %v268_v42 = vrot.slane %v266_v31, 5  ;;  %v271_v46 = vshrl.u32 %v2768_v32, 16  ;;  %v2808_v4 = vld [vmem:[%s2726_s26 + $0x2c] sm:$0x1] }
  0x26   : > { %v253_v43 = vor.u32 %v252_v35, %v249_v34  ;;  %v274_v47 = vshll.u32 %v2768_v32, 16  ;;  %v263_v50 = vor.u32 %v262_v41, %v258_v36  ;;  %v280_v51 = vshll.u32 %v2777_v37, 16  ;;  %v2814_v13 = vld [vmem:[%s2726_s26 + $0x30] sm:$0xf]  ;;  %v2821_v22 = vld [vmem:[%s3329_s1 + $0x4] sm:$0x3] }
  0x27   : > { %v235_v48 = vsel %vm2772_vm4, %v230_v39, %v234_v21  ;;  %v245_v49 = vsel %vm2772_vm4, %v240_v40, %v244_v24  ;;  %v273_v54 = vrot.slane %v271_v46, 4  ;;  %v284_v59 = vshrl.u32 %v2777_v37, 16  ;;  %v2826_v28 = vld [vmem:[%s2726_s26 + $0x34] sm:$0xf]  ;;  %v2833_v34 = vld [vmem:[%s2726_s26 + $0x38] sm:$0x1] }
  0x28   : > { %v1917_v52 = vcombine.low %v235_v48, %v245_v49  ;;  %v254_v53 = vrot.slane %v253_v43, 4  ;;  %v276_v55 = vrot.slane %v274_v47, 5  ;;  %v264_v57 = vrot.slane %v263_v50, 4  ;;  %s3246_s24 = scalar_lea.vmem [#allocation2], %s1911_s21  ;;  %s2037_s25 = sshll.u32 %s2588_s12, 4 }
  0x29   : > { %v282_v58 = vrot.slane %v280_v51, 5  ;;  %v290_v60 = vshll.u32 %v2785_v45, 16  ;;  %v757_v0 = vrot.slane %v2777_v37, 5  ;;  %v760_v2 = vrot.slane %v2785_v45, 5  ;;  %v2846_v51 = vld [vmem:[%s2726_s26 + $0x3c] sm:$0xf] }
  0x2a   : > { %2126 = vmatprep.mubr.msk.bf16.mxu1 %vm440_vm3, %v1917_v52  ;;  %v259_v62 = vsel %vm2772_vm4, %v254_v53, %v258_v36  ;;  %v277_v63 = vor.u32 %v276_v55, %v273_v54  ;;  %v269_v5 = vsel %vm2772_vm4, %v264_v57, %v268_v42  ;;  %v286_v10 = vrot.slane %v284_v59, 4  ;;  %v2851_v57 = vld [vmem:[%s2726_s26 + $0x40] sm:$0xf]  ;;  %s1808_s30 = sshll.u32 %s3246_s24, 4  ;;  %s3276_s4 = scalar_lea.sflag [#allocation3], %s170_s18  ;;  %s3269_s30 = int_to_ptr.vmem [resolvable:$true] %s1808_s30 }
  0x2b   : > { %v292_v11 = vrot.slane %v290_v60, 5  ;;  %v295_v12 = vshrl.u32 %v2795_v56, 16  ;;  %v1918_v15 = vcombine.low %v259_v62, %v269_v5  ;;  %v298_v20 = vshll.u32 %v2795_v56, 16  ;;  %s2510_s5 = scalar_lea.vmem %s3269_s30, 2048  ;;  %s2514_s7 = sshll.u32 %s2606_s6, 4  ;;  %s2515_s7 = int_to_ptr.vmem [resolvable:$false] %s2514_s7 }
  0x2c   : > { %v278_v19 = vrot.slane %v277_v63, 4  ;;  %v304_v21 = vshll.u32 %v2800_v61, 16  ;;  %v287_v24 = vor.u32 %v286_v10, %v282_v58  ;;  %v308_v26 = vshrl.u32 %v2800_v61, 16  ;;  %p2511_p13 = scmp.ne.s32.totalorder %s3269_s30, %s2510_s5  ;;  %s2516_s8 = scalar_lea.vmem %s2515_s7, 4096 }
  0x2d   : > { %v297_v25 = vrot.slane %v295_v12, 4  ;;  %v314_v27 = vshll.u32 %v2808_v4, 16  ;;  %2198 = vmatprep.mubr.msk.bf16.mxu0 %vm440_vm3, %v1918_v15  ;;  %2127 = vmatmul.mubr.msk.bf16.vlgmr.msra.gmra.mrb[0].mxu1 %vm440_vm3, %v1918_v15  ;;  %v300_v30 = vrot.slane %v298_v20, 5  ;;  %v319_v35 = vshrl.u32 %v2814_v13, 16  ;;  %v2872_v20 = vld [vmem:[%s2726_s26 + $0x44] sm:$0x1]  ;;  %p2517_p2 = scmp.lt.s32.totalorder %s3269_s30, %s2515_s7  ;;  %p2518_p4 = scmp.lt.s32.totalorder %s2516_s8, %s2510_s5 }
  0x2e   : > { %v283_v29 = vsel %vm2772_vm4, %v278_v19, %v282_v58  ;;  %v306_v31 = vrot.slane %v304_v21, 5  ;;  %2143 = vmatpush3.bf16.msra.mxu1 %v2729_v6  ;;  %v288_v36 = vrot.slane %v287_v24, 4  ;;  %v310_v39 = vrot.slane %v308_v26, 4  ;;  %p2512_p0 = pnand %p2511_p13, %p2675_p3 }
  0x2f   : > { %v316_v40 = vrot.slane %v314_v27, 5  ;;  %v322_v41 = vshll.u32 %v2814_v13, 16  ;;  %v301_v42 = vor.u32 %v300_v30, %v297_v25  ;;  %v321_v43 = vrot.slane %v319_v35, 4  ;;  %2418 = vmatprep.subr.msk.bf16.mxu1 %vm465_vm0, %v2821_v22  ;;  %p2519_p5 = por %p2518_p4, %p2517_p2 }
  0x30   : > { %v328_v46 = vshll.u32 %v2826_v28, 16  ;;  %v332_v47 = vshrl.u32 %v2826_v28, 16  ;;  %v293_v48 = vsel %vm2772_vm4, %v288_v36, %v292_v11  ;;  %v311_v49 = vor.u32 %v310_v39, %v306_v31  ;;  %v2885_v36 = vld [vmem:[%s2726_s26 + $0x48] sm:$0xf]  ;;  %p2513_p1 = pneg %p2512_p0 }
  0x31   : > { %v324_v6 = vrot.slane %v322_v41, 5  ;;  %v338_v50 = vshll.u32 %v2833_v34, 16  ;;  %v2848_v52 = vcombine.low %v283_v29, %v293_v48  ;;  %v302_v53 = vrot.slane %v301_v42, 4  ;;  %v2900_v42 = vld [vmem:[%s2726_s26 + $0x4c] sm:$0xf] }
  0x32   : > { %v330_v54 = vrot.slane %v328_v46, 5  ;;  %v334_v55 = vrot.slane %v332_v47, 4  ;;  %v312_v58 = vrot.slane %v311_v49, 4  ;;  %v1950_v63 = vrot.slane %v2745_v14, 9  ;;  %p2520_p6 = pnand %p2519_p5, %p2513_p1 }
  0x33   : > { %v325_v59 = vor.u32 %v324_v6, %v321_v43  ;;  %v340_v60 = vrot.slane %v338_v50, 5  ;;  %2199 = vmatmul.mubr.msk.bf16.vlgmr.msra.gmra.mrb[0].mxu0 %vm440_vm3, %v2848_v52  ;;  %2130 = vmatprep.mubr.msk.bf16.mxu1 %vm440_vm3, %v2848_v52  ;;  %v307_v5 = vsel %vm2772_vm4, %v302_v53, %v306_v31  ;;  %v750_v11 = vrot.slane %v2749_v16, 5 }
  0x34   : > { %v335_v10 = vor.u32 %v334_v55, %v330_v54  ;;  %v343_v12 = vshrl.u32 %v2846_v51, 16  ;;  %2215 = vmatpush3.bf16.msra.mxu0 %v2755_v18  ;;  %v317_v15 = vsel %vm2772_vm4, %v312_v58, %v316_v40  ;;  %v346_v21 = vshll.u32 %v2846_v51, 16 }
  0x35   : > { %v326_v19 = vrot.slane %v325_v59, 4  ;;  %v352_v24 = vshll.u32 %v2851_v57, 16  ;;  %v2876_v25 = vcombine.low %v307_v5, %v317_v15  ;;  %v751_v27 = vsel %vm2855_vm7, %v1950_v63, %v750_v11  ;;  %2423 = vmatprep.subr.msk.bf16.mxu0 %vm465_vm0, %v2760_v23 }
  0x36   : > { %v336_v26 = vrot.slane %v335_v10, 4  ;;  %v752_v29 = vrot.slane %v750_v11, 4  ;;  %v345_v30 = vrot.slane %v343_v12, 4  ;;  %v348_v31 = vrot.slane %v346_v21, 5 }
  0x37   : > { %v331_v18 = vsel %vm2772_vm4, %v326_v19, %v330_v54  ;;  %v354_v35 = vrot.slane %v352_v24, 5  ;;  %2202 = vmatprep.mubr.msk.bf16.mxu0 %vm440_vm3, %v2876_v25  ;;  %2131 = vmatmul.mubr.msk.bf16.gmra.mrb[4].mxu1 %vm440_vm3, %v2876_v25  ;;  %v356_v40 = vshrl.u32 %v2851_v57, 16  ;;  %v362_v41 = vshll.u32 %v2872_v20, 16  ;;  %v2917_v54 = vld [vmem:[%s2726_s26 + $0x50] sm:$0x1] }
  0x38   : > { %v341_v39 = vsel %vm2772_vm4, %v336_v26, %v340_v60  ;;  %v754_v23 = vsel %vm2855_vm7, %v752_v29, %v753_v44  ;;  %v349_v47 = vor.u32 %v348_v31, %v345_v30  ;;  %v1951_v48 = vrot.slane %v2768_v32, 9  ;;  %v2942_v29 = vld [vmem:[%s2726_s26 + $0x58] sm:$0xf] }
  0x39   : > { %v2902_v43 = vcombine.low %v331_v18, %v341_v39  ;;  %v2904_v46 = vcombine.low %v751_v27, %v754_v23  ;;  %v358_v49 = vrot.slane %v356_v40, 4  ;;  %v364_v17 = vrot.slane %v362_v41, 5  ;;  %v2948_v39 = vld [vmem:[%s2726_s26 + $0x5c] sm:$0x1] }
  0x3a   : > { %v759_v6 = vrot.slane %v757_v0, 4  ;;  %v367_v44 = vshrl.u32 %v2885_v36, 16  ;;  %v350_v50 = vrot.slane %v349_v47, 4  ;;  %v758_v53 = vsel %vm2855_vm7, %v1951_v48, %v757_v0  ;;  %v2929_v0 = vld [vmem:[%s2726_s26 + $0x54] sm:$0xf] }
  0x3b   : > { %2134 = vmatprep.mubr.msk.bf16.mxu1 %vm440_vm3, %v2902_v43  ;;  %v370_v55 = vshll.u32 %v2885_v36, 16  ;;  %v376_v58 = vshll.u32 %v2900_v42, 16  ;;  %2203 = vmatmul.mubr.msk.bf16.gmra.mrb[4].mxu0 %vm440_vm3, %v2902_v43  ;;  %v359_v59 = vor.u32 %v358_v49, %v354_v35  ;;  %v380_v5 = vshrl.u32 %v2900_v42, 16 }
  0x3c   : > { %v761_v60 = vsel %vm2855_vm7, %v759_v6, %v760_v2  ;;  %v369_v63 = vrot.slane %v367_v44, 4  ;;  %2216 = vmatprep.mubr.msk.bf16.mxu0 %vm440_vm3, %v2904_v46  ;;  %v355_v10 = vsel %vm2772_vm4, %v350_v50, %v354_v35  ;;  %v386_v2 = vshll.u32 %v2917_v54, 16 }
  0x3d   : > { %v2935_v11 = vcombine.low %v758_v53, %v761_v60  ;;  %v372_v12 = vrot.slane %v370_v55, 5  ;;  %v378_v45 = vrot.slane %v376_v58, 5  ;;  %v360_v15 = vrot.slane %v359_v59, 4  ;;  %v2967_v58 = vld [vmem:[%s3329_s1 + $0xe] sm:$0x3] }
  0x3e   : > { %v382_v19 = vrot.slane %v380_v5, 4  ;;  %v1952_v21 = vrot.slane %v2795_v56, 9  ;;  %v764_v26 = vrot.slane %v2800_v61, 5  ;;  %v767_v27 = vrot.slane %v2808_v4, 5 }
  0x3f   : > { %v373_v24 = vor.u32 %v372_v12, %v369_v63  ;;  %v391_v18 = vshrl.u32 %v2929_v0, 16  ;;  %v365_v30 = vsel %vm2772_vm4, %v360_v15, %v364_v17  ;;  %v388_v35 = vrot.slane %v386_v2, 5 }
  0x40   : > { %v383_v31 = vor.u32 %v382_v19, %v378_v45  ;;  %v394_v23 = vshll.u32 %v2929_v0, 16  ;;  %v2951_v40 = vcombine.low %v355_v10, %v365_v30  ;;  %v765_v47 = vsel %vm2855_vm7, %v1952_v21, %v764_v26 }
  0x41   : > { %v374_v41 = vrot.slane %v373_v24, 4  ;;  %v766_v4 = vrot.slane %v764_v26, 4  ;;  %v393_v49 = vrot.slane %v391_v18, 4  ;;  %v400_v44 = vshll.u32 %v2942_v29, 16 }
  0x42   : > { %v384_v48 = vrot.slane %v383_v31, 4  ;;  %v396_v6 = vrot.slane %v394_v23, 5  ;;  %2135 = vmatmul.mubr.msk.bf16.gmra.mrb[8].mxu1 %vm440_vm3, %v2951_v40  ;;  %v404_v53 = vshrl.u32 %v2942_v29, 16  ;;  %v410_v55 = vshll.u32 %v2948_v39, 16 }
  0x43   : > { %v379_v17 = vsel %vm2772_vm4, %v374_v41, %v378_v45  ;;  %v768_v50 = vsel %vm2855_vm7, %v766_v4, %v767_v27  ;;  %2217 = vmatmul.mubr.msk.bf16.vlgmr.msra.gmra.mrb[0].mxu0 %vm440_vm3, %v2935_v11  ;;  %v402_v5 = vrot.slane %v400_v44, 5  ;;  %v1953_v45 = vrot.slane %v2814_v13, 9 }
  0x44   : > { %v389_v59 = vsel %vm2772_vm4, %v384_v48, %v388_v35  ;;  %v2973_v60 = vcombine.low %v765_v47, %v768_v50  ;;  %v397_v63 = vor.u32 %v396_v6, %v393_v49  ;;  %2233 = vmatpush3.bf16.msra.mxu0 %v2781_v38  ;;  %v406_v12 = vrot.slane %v404_v53, 4  ;;  %v3011_v53 = vld [vmem:[%s2726_s26 + $0x64] sm:$0xf] }
  0x45   : > { %v2976_v10 = vcombine.low %v379_v17, %v389_v59  ;;  %v771_v19 = vrot.slane %v2826_v28, 5  ;;  %v774_v2 = vrot.slane %v2833_v34, 5  ;;  %v1954_v21 = vrot.slane %v2846_v51, 9  ;;  %2424 = vmatprep.subr.msk.bf16.mxu0 %vm465_vm0, %v2967_v58 }
  0x46   : > { %2220 = vmatprep.mubr.msk.bf16.mxu0 %vm440_vm3, %v2973_v60  ;;  %v398_v15 = vrot.slane %v397_v63, 4  ;;  %v407_v38 = vor.u32 %v406_v12, %v402_v5  ;;  %v412_v24 = vrot.slane %v410_v55, 5  ;;  %v778_v26 = vrot.slane %v2851_v57, 5 }
  0x47   : > { %2138 = vmatprep.mubr.msk.bf16.mxu1 %vm440_vm3, %v2976_v10  ;;  %v781_v27 = vrot.slane %v2872_v20, 5  ;;  %v772_v18 = vsel %vm2855_vm7, %v1953_v45, %v771_v19  ;;  %v773_v30 = vrot.slane %v771_v19, 4  ;;  %v1933_v34 = vcombine.low %v2732_v7, %v2735_v8  ;;  %v3033_v19 = vld [vmem:[%s2726_s26 + $0x68] sm:$0x1] }
  0x48   : > { %v785_v31 = vrot.slane %v2900_v42, 5  ;;  %v403_v35 = vsel %vm2772_vm4, %v398_v15, %v402_v5  ;;  %v408_v23 = vrot.slane %v407_v38, 4  ;;  %v779_v41 = vsel %vm2855_vm7, %v1954_v21, %v778_v26  ;;  %v3022_v5 = vld [vmem:[%s2726_s26 + $0x60] sm:$0xf] }
  0x49   : > { %v780_v47 = vrot.slane %v778_v26, 4  ;;  %v775_v20 = vsel %vm2855_vm7, %v773_v30, %v774_v2  ;;  %v1955_v4 = vrot.slane %v2885_v36, 9  ;;  %v788_v49 = vrot.slane %v2917_v54, 5 }
  0x4a   : > { %v787_v48 = vrot.slane %v785_v31, 4  ;;  %v413_v6 = vsel %vm2772_vm4, %v408_v23, %v412_v24  ;;  %v3005_v44 = vcombine.low %v772_v18, %v775_v20  ;;  %v1956_v50 = vrot.slane %v2929_v0, 9  ;;  %v3058_v23 = vld [vmem:[%s2726_s26 + $0x70] sm:$0xf] }
  0x4b   : > { %v782_v17 = vsel %vm2855_vm7, %v780_v47, %v781_v27  ;;  %v3013_v55 = vcombine.low %v403_v35, %v413_v6  ;;  %v792_v63 = vrot.slane %v2942_v29, 5  ;;  %v795_v54 = vrot.slane %v2948_v39, 5 }
  0x4c   : > { %v3015_v59 = vcombine.low %v779_v41, %v782_v17  ;;  %2221 = vmatmul.mubr.msk.bf16.gmra.mrb[4].mxu0 %vm440_vm3, %v3005_v44  ;;  %v786_v12 = vsel %vm2855_vm7, %v1955_v4, %v785_v31  ;;  %v789_v45 = vsel %vm2855_vm7, %v787_v48, %v788_v49  ;;  %v1240_v39 = vrot.slane %v3011_v53, 5  ;;  %v217_v49 = vld [vmem:[%s2726_s26 + $0x74] sm:$0x1] }
  0x4d   : > { %2139 = vmatmul.mubr.msk.bf16.gmra.mrb[12].mxu1 %vm440_vm3, %v3013_v55  ;;  %v794_v15 = vrot.slane %v792_v63, 4  ;;  %v793_v2 = vsel %vm2855_vm7, %v1956_v50, %v792_v63  ;;  %v746_v21 = vrot.slane %v2738_v9, 5  ;;  %v1994_v24 = vrot.slane %v3022_v5, 9 }
  0x4e   : > { %2224 = vmatprep.mubr.msk.bf16.mxu0 %vm440_vm3, %v3015_v59  ;;  %2144 = vmatprep.mubr.msk.bf16.mxu1 %vm440_vm3, %v1933_v34  ;;  %v1949_v26 = vrot.slane %v2732_v7, 9  ;;  %v3044_v27 = vcombine.low %v786_v12, %v789_v45  ;;  %v1242_v18 = vrot.slane %v1240_v39, 4  ;;  %v1243_v30 = vrot.slane %v3033_v19, 5  ;;  %v3049_v34 = vld [vmem:[%s2726_s26 + $0x6c] sm:$0xf]  ;;  %s2038_s26 = sshll.u32 %s2592_s13, 5 }
  0x4f   : > { %v796_v38 = vsel %vm2855_vm7, %v794_v15, %v795_v54  ;;  %v743_v31 = vrot.slane %v2735_v8, 5  ;;  %v3053_v9 = vcombine.low %v2745_v14, %v2749_v16  ;;  %v1496_v7 = vshrl.u32 %v3049_v34, 16  ;;  %s1805_s28 = sadd.s32 %s2038_s26, %s2037_s25 }
  0x50   : > { %v3055_v35 = vcombine.low %v793_v2, %v796_v38  ;;  %v1499_v41 = vshll.u32 %v3049_v34, 16  ;;  %v3064_v47 = vcombine.low %v2768_v32, %v2777_v37  ;;  %v1509_v4 = vshrl.u32 %v3058_v23, 16  ;;  %v1974_v37 = vld [vmem:[%s3329_s1 + $0x6] sm:$0x3]  ;;  %s2039_s29 = sshll.u32 %s1805_s28, 7 }
  0x51   : > { %v744_v8 = vsel %vm2855_vm7, %v1949_v26, %v743_v31  ;;  %v745_v20 = vrot.slane %v743_v31, 4  ;;  %v848_v14 = vsel %vm465_vm0, %v2821_v22, 0  ;;  %v1241_v16 = vsel %vm2855_vm7, %v1994_v24, %v1240_v39  ;;  %s3267_s3 = scalar_lea.hbm %s3330_s2, %s2039_s29 }
  0x52   : > { %v1244_v48 = vsel %vm2855_vm7, %v1242_v18, %v1243_v30  ;;  %v1498_v6 = vrot.slane %v1496_v7, 4  ;;  %v1501_v17 = vrot.slane %v1499_v41, 5  ;;  %v1505_v63 = vshll.u32 %v3058_v23, 16 }
  0x53   : > { %v747_v32 = vsel %vm2855_vm7, %v745_v20, %v746_v21  ;;  %v1511_v54 = vrot.slane %v1509_v4, 4  ;;  %v3090_v12 = vcombine.low %v1241_v16, %v1244_v48  ;;  %v1515_v45 = vshll.u32 %v217_v49, 16 }
  0x54   : > { %2225 = vmatmul.mubr.msk.bf16.gmra.mrb[8].mxu0 %vm440_vm3, %v3044_v27  ;;  %v1958_v22 = vcombine.low %v744_v8, %v747_v32  ;;  %v1502_v50 = vor.u32 %v1501_v17, %v1498_v6  ;;  %v2025_v15 = vrot.slane %v3049_v34, 9  ;;  %v1507_v2 = vrot.slane %v1505_v63, 5 }
  0x55   : > { %2145 = vmatmul.mubr.msk.bf16.vlgmr.msra.gmra.mrb[0].mxu1 %vm440_vm3, %v3053_v9  ;;  %2228 = vmatprep.mubr.msk.bf16.mxu0 %vm440_vm3, %v3055_v35  ;;  %v1646_v21 = vrot.slane %v3058_v23, 5  ;;  %v1649_v38 = vrot.slane %v217_v49, 5  ;;  %v3097_v24 = vcombine.low %v2795_v56, %v2800_v61  ;;  %v3101_v26 = vcombine.low %v2814_v13, %v2826_v28 }
  0x56   : > { %2161 = vmatpush3.bf16.msra.mxu1 %v848_v14  ;;  %2148 = vmatprep.mubr.msk.bf16.mxu1 %vm440_vm3, %v3064_v47  ;;  %v1503_v39 = vrot.slane %v1502_v50, 4  ;;  %v1517_v18 = vrot.slane %v1515_v45, 5  ;;  %v1512_v31 = vor.u32 %v1511_v54, %v1507_v2  ;;  %v3127_v62 = vcombine.low %v2846_v51, %v2851_v57  ;;  %v2026_v14 = vld [vmem:[%s3329_s1 + $0x10] sm:$0x3] }
  0x57   : > { %2419 = vmatprep.subr.msk.bf16.mxu1 %vm465_vm0, %v1974_v37  ;;  %v3107_v7 = vsel %vm2855_vm7, %v2025_v15, %v1646_v21  ;;  %v1648_v41 = vrot.slane %v1646_v21, 4  ;;  %v1528_v20 = vsel %vm465_vm0, %v2967_v58, 0  ;;  %v3133_v4 = vcombine.low %v2885_v36, %v2900_v42 }
  0x58   : > { %v1508_v30 = vsel %vm2772_vm4, %v1503_v39, %v1507_v2  ;;  %v1513_v8 = vrot.slane %v1512_v31, 4  ;;  %v1940_v51 = vcombine.low %v2929_v0, %v2942_v29  ;;  %v1975_v57 = vcombine.low %v3022_v5, %v3011_v53 }
  0x59   : > { %v3113_v56 = vsel %vm2855_vm7, %v1648_v41, %v1649_v38  ;;  %v974_v36 = vsel %vm465_vm0, %v1974_v37, 0  ;;  %v2006_v42 = vcombine.low %v3049_v34, %v3058_v23  ;;  %v1093_v0 = vshll.u32 %v3022_v5, 16 }
  0x5a   : > { %v2027_v61 = vcombine.low %v3107_v7, %v3113_v56  ;;  %v1518_v13 = vsel %vm2772_vm4, %v1513_v8, %v1517_v18  ;;  %v1103_v29 = vshrl.u32 %v3011_v53, 16  ;;  %v1660_v58 = vsel %vm465_vm0, %v2026_v14, 0 }
  0x5b   : > { %v2016_v28 = vcombine.low %v1508_v30, %v1518_v13  ;;  %v1095_v23 = vrot.slane %v1093_v0, 5 }
  0x5c   : > { %2229 = vmatmul.mubr.msk.bf16.gmra.mrb[12].mxu0 %vm440_vm3, %v3090_v12  ;;  %v1105_v48 = vrot.slane %v1103_v29, 4 }
  0x5d   : > { %2149 = vmatmul.mubr.msk.bf16.gmra.mrb[4].mxu1 %vm440_vm3, %v3097_v24  ;;  %2234 = vmatprep.mubr.msk.bf16.mxu0 %vm440_vm3, %v3064_v47 }
  0x5e   : > { %2152 = vmatprep.mubr.msk.bf16.mxu1 %vm440_vm3, %v3101_v26 }
  0x64   : > { %2235 = vmatmul.mubr.msk.bf16.vlgmr.msra.gmra.mrb[0].mxu0 %vm440_vm3, %v3097_v24 }
  0x65   : > { %2153 = vmatmul.mubr.msk.bf16.gmra.mrb[8].mxu1 %vm440_vm3, %v3127_v62  ;;  %2251 = vmatpush3.bf16.msra.mxu0 %v1528_v20 }
  0x66   : > { %2156 = vmatprep.mubr.msk.bf16.mxu1 %vm440_vm3, %v3133_v4  ;;  %2238 = vmatprep.mubr.msk.bf16.mxu0 %vm440_vm3, %v3101_v26 }
  0x67   : > { %2425 = vmatprep.subr.msk.bf16.mxu0 %vm465_vm0, %v2026_v14 }
  0x6c   : > { %2239 = vmatmul.mubr.msk.bf16.gmra.mrb[4].mxu0 %vm440_vm3, %v3127_v62 }
  0x6d   : > { %2157 = vmatmul.mubr.msk.bf16.gmra.mrb[12].mxu1 %vm440_vm3, %v1940_v51  ;;  %2242 = vmatprep.mubr.msk.bf16.mxu0 %vm440_vm3, %v3133_v4 }
  0x6e   : > { %2162 = vmatprep.mubr.msk.bf16.mxu1 %vm440_vm3, %v1958_v22 }
  0x74   : > { %2243 = vmatmul.mubr.msk.bf16.gmra.mrb[8].mxu0 %vm440_vm3, %v1940_v51 }
  0x75   : > { %2163 = vmatmul.mubr.msk.bf16.vlgmr.msra.gmra.mrb[0].mxu1 %vm440_vm3, %v2904_v46  ;;  %2246 = vmatprep.mubr.msk.bf16.mxu0 %vm440_vm3, %v1975_v57  ;;  %v1090_v46 = vshrl.u32 %v3022_v5, 16  ;;  %v1109_v5 = vshll.u32 %v3033_v19, 16 }
  0x76   : > { %2179 = vmatpush3.bf16.msra.mxu1 %v974_v36  ;;  %2166 = vmatprep.mubr.msk.bf16.mxu1 %vm440_vm3, %v2935_v11 }
  0x77   : > { %2421 = vmatprep.subr.msk.bf16.mxu1 %vm465_vm0, %v2701_v1  ;;  %v1099_v1 = vshll.u32 %v3011_v53, 16  ;;  %v1092_v34 = vrot.slane %v1090_v46, 4  ;;  %v1111_v49 = vrot.slane %v1109_v5, 5 }
  0x79   : > { %v1101_v16 = vrot.slane %v1099_v1, 5 }
  0x7b   : > { %v1106_v53 = vor.u32 %v1105_v48, %v1101_v16 }
  0x7c   : > { %2247 = vmatmul.mubr.msk.bf16.gmra.mrb[12].mxu0 %vm440_vm3, %v2006_v42 }
  0x7d   : > { %2167 = vmatmul.mubr.msk.bf16.gmra.mrb[4].mxu1 %vm440_vm3, %v2973_v60  ;;  %2252 = vmatprep.mubr.msk.bf16.mxu0 %vm440_vm3, %v2848_v52  ;;  %v1096_v52 = vor.u32 %v1095_v23, %v1092_v34  ;;  %v1107_v37 = vrot.slane %v1106_v53, 4 }
  0x7e   : > { %2170 = vmatprep.mubr.msk.bf16.mxu1 %vm440_vm3, %v3005_v44 }
  0x7f   : > { %v1097_v32 = vrot.slane %v1096_v52, 4 }
  0x84   : > { %2253 = vmatmul.mubr.msk.bf16.vlgmr.msra.gmra.mrb[0].mxu0 %vm440_vm3, %v2876_v25  ;;  %v1102_v25 = vsel %vm2772_vm4, %v1097_v32, %v1101_v16 }
  0x85   : > { %2171 = vmatmul.mubr.msk.bf16.gmra.mrb[8].mxu1 %vm440_vm3, %v3015_v59  ;;  %2269 = vmatpush3.bf16.msra.mxu0 %v1660_v58 }
  0x86   : > { %2174 = vmatprep.mubr.msk.bf16.mxu1 %vm440_vm3, %v3044_v27  ;;  %2256 = vmatprep.mubr.msk.bf16.mxu0 %vm440_vm3, %v2902_v43  ;;  %v1112_v43 = vsel %vm2772_vm4, %v1107_v37, %v1111_v49 }
  0x87   : > { %v1985_v19 = vcombine.low %v1102_v25, %v1112_v43 }
  0x8c   : > { %2257 = vmatmul.mubr.msk.bf16.gmra.mrb[4].mxu0 %vm440_vm3, %v2951_v40 }
  0x8d   : > { %2175 = vmatmul.mubr.msk.bf16.gmra.mrb[12].mxu1 %vm440_vm3, %v3055_v35  ;;  %2260 = vmatprep.mubr.msk.bf16.mxu0 %vm440_vm3, %v2976_v10 }
  0x8e   : > { %2180 = vmatprep.mubr.msk.bf16.mxu1 %vm440_vm3, %v3053_v9 }
  0x94   : > { %2261 = vmatmul.mubr.msk.bf16.gmra.mrb[8].mxu0 %vm440_vm3, %v3013_v55 }
  0x95   : > { %2181 = vmatmul.mubr.msk.bf16.vlgmr.msra.gmra.mrb[0].mxu1 %vm440_vm3, %v3064_v47  ;;  %2264 = vmatprep.mubr.msk.bf16.mxu0 %vm440_vm3, %v1985_v19 }
  0x96   : > { %2287 = vmatpush3.bf16.msra.mxu1 %v2710_v3  ;;  %2184 = vmatprep.mubr.msk.bf16.mxu1 %vm440_vm3, %v3097_v24 }
  0x9c   : > { %2265 = vmatmul.mubr.msk.bf16.gmra.mrb[12].mxu0 %vm440_vm3, %v2016_v28 }
  0x9d   : > { %2185 = vmatmul.mubr.msk.bf16.gmra.mrb[4].mxu1 %vm440_vm3, %v3101_v26  ;;  %2270 = vmatprep.mubr.msk.bf16.mxu0 %vm440_vm3, %v2935_v11 }
  0x9e   : > { %2188 = vmatprep.mubr.msk.bf16.mxu1 %vm440_vm3, %v3127_v62 }
  0xa4   : > { %2271 = vmatmul.mubr.msk.bf16.vlgmr.msra.gmra.mrb[0].mxu0 %vm440_vm3, %v2973_v60 }
  0xa5   : > { %2189 = vmatmul.mubr.msk.bf16.gmra.mrb[8].mxu1 %vm440_vm3, %v3133_v4  ;;  %2274 = vmatprep.mubr.msk.bf16.mxu0 %vm440_vm3, %v3005_v44 }
  0xa6   : > { %2192 = vmatprep.mubr.msk.bf16.mxu1 %vm440_vm3, %v1940_v51 }
  0xac   : > { %2275 = vmatmul.mubr.msk.bf16.gmra.mrb[4].mxu0 %vm440_vm3, %v3015_v59 }
  0xad   : > { %2193 = vmatmul.mubr.msk.bf16.gmra.mrb[12].mxu1 %vm440_vm3, %v1975_v57  ;;  %2278 = vmatprep.mubr.msk.bf16.mxu0 %vm440_vm3, %v3044_v27 }
  0xae   : > { %2206 = vmatprep.mubr.msk.bf16.mxu1 %vm440_vm3, %v2951_v40 }
  0xb4   : > { %2279 = vmatmul.mubr.msk.bf16.gmra.mrb[8].mxu0 %vm440_vm3, %v3055_v35 }
  0xb5   : > { %2207 = vmatmul.mubr.msk.bf16.vlgmr.msra.gmra.mrb[8].mxu1 %vm440_vm3, %v2976_v10  ;;  %2282 = vmatprep.mubr.msk.bf16.mxu0 %vm440_vm3, %v3090_v12 }
  0xb6   : > { %2210 = vmatprep.mubr.msk.bf16.mxu1 %vm440_vm3, %v3013_v55 }
  0xbc   : > { %2283 = vmatmul.mubr.msk.bf16.gmra.mrb[12].mxu0 %vm440_vm3, %v2027_v61 }
  0xbd   : > { %2211 = vmatmul.mubr.msk.bf16.gmra.mrb[12].mxu1 %vm440_vm3, %v1985_v19 }
 0x168   : > { %v2182_v3 = vpop.f32.mrb[0].mxu1 }
 0x169   : > { %v1010_v33 = vpop.f32.mrb[1].mxu1 }
 0x16a   : > { %v2183_v11 = vpop.f32.mrb[2].mxu1 }
 0x16b   : > { %v1013_v40 = vpop.f32.mrb[3].mxu1 }
 0x170   : > { %v2186_v60 = vpop.f32.mrb[4].mxu1 }
 0x171   : > { %v1026_v44 = vpop.f32.mrb[5].mxu1 }
 0x172   : > { %v2187_v10 = vpop.f32.mrb[6].mxu1 }
 0x173   : > { %v1029_v59 = vpop.f32.mrb[7].mxu1 }
 0x177   : > { %v2272_v27 = vpop.f32.mrb[0].mxu0 }
 0x178   : > { %v2288_v55 = vadd.f32 %v2272_v27, %v2182_v3  ;;  %v1696_v9 = vpop.f32.mrb[1].mxu0 }
 0x179   : > { %v2289_v35 = vadd.f32 %v1696_v9, %v1010_v33  ;;  %v2273_v47 = vpop.f32.mrb[2].mxu0 }
 0x17a   : > { %1777 = vst [vmem:[%s3246_s24 + $0x10] sm:$0xff] %v2288_v55  ;;  %v2290_v6 = vadd.f32 %v2273_v47, %v2183_v11  ;;  %v1699_v17 = vpop.f32.mrb[3].mxu0 }
 0x17b   : > { %1775 = vst [vmem:[%s3246_s24] sm:$0xff] %v2289_v35  ;;  %v2291_v22 = vadd.f32 %v1699_v17, %v1013_v40 }
 0x17c   : > { %1778 = vst [vmem:[%s3246_s24 + $0x18] sm:$0xff] %v2290_v6 }
 0x17d   : > { %1776 = vst [vmem:[%s3246_s24 + $0x8] sm:$0xff] %v2291_v22 }
 0x17f   : > { %v2276_v50 = vpop.f32.mrb[4].mxu0 }
 0x180   : > { %v2292_v63 = vadd.f32 %v2276_v50, %v2186_v60  ;;  %v1712_v54 = vpop.f32.mrb[5].mxu0 }
 0x181   : > { %v2293_v12 = vadd.f32 %v1712_v54, %v1026_v44  ;;  %v2277_v45 = vpop.f32.mrb[6].mxu0 }
 0x182   : > { %1781 = vst [vmem:[%s3246_s24 + $0x30] sm:$0xff] %v2292_v63  ;;  %v2294_v15 = vadd.f32 %v2277_v45, %v2187_v10  ;;  %v1715_v39 = vpop.f32.mrb[7].mxu0 }
 0x183   : > { %1779 = vst [vmem:[%s3246_s24 + $0x20] sm:$0xff] %v2293_v12  ;;  %v2295_v2 = vadd.f32 %v1715_v39, %v1029_v59 }
 0x184   : > { %1782 = vst [vmem:[%s3246_s24 + $0x38] sm:$0xff] %v2294_v15 }
 0x185   : > { %1780 = vst [vmem:[%s3246_s24 + $0x28] sm:$0xff] %v2295_v2 }
 0x187   : > { %v2280_v21 = vpop.f32.mrb[8].mxu0 }
 0x188   : > { %v2208_v38 = vpop.f32.mrb[8].mxu1  ;;  %v1728_v24 = vpop.f32.mrb[9].mxu0 }
 0x189   : > { %v2296_v26 = vadd.f32 %v2280_v21, %v2208_v38  ;;  %v1190_v18 = vpop.f32.mrb[9].mxu1  ;;  %v2281_v30 = vpop.f32.mrb[10].mxu0 }
 0x18a   : > { %v2297_v31 = vadd.f32 %v1728_v24, %v1190_v18  ;;  %v2209_v7 = vpop.f32.mrb[10].mxu1  ;;  %v1731_v41 = vpop.f32.mrb[11].mxu0 }
 0x18b   : > { %1785 = vst [vmem:[%s3246_s24 + $0x50] sm:$0xff] %v2296_v26  ;;  %v2298_v8 = vadd.f32 %v2281_v30, %v2209_v7  ;;  %v1193_v56 = vpop.f32.mrb[11].mxu1 }
 0x18c   : > { %1783 = vst [vmem:[%s3246_s24 + $0x40] sm:$0xff] %v2297_v31  ;;  %v2299_v61 = vadd.f32 %v1731_v41, %v1193_v56 }
 0x18d   : > { %1786 = vst [vmem:[%s3246_s24 + $0x58] sm:$0xff] %v2298_v8 }
 0x18e   : > { %1784 = vst [vmem:[%s3246_s24 + $0x48] sm:$0xff] %v2299_v61 }
 0x18f   : > { %v2284_v13 = vpop.f32.mrb[12].mxu0 }
 0x190   : > { %v2212_v28 = vpop.f32.mrb[12].mxu1  ;;  %v1744_v62 = vpop.f32.mrb[13].mxu0 }
 0x191   : > { %v2300_v20 = vadd.f32 %v2284_v13, %v2212_v28  ;;  %v1206_v4 = vpop.f32.mrb[13].mxu1  ;;  %v2285_v14 = vpop.f32.mrb[14].mxu0 }
 0x192   : > { %v2301_v51 = vadd.f32 %v1744_v62, %v1206_v4  ;;  %v2213_v57 = vpop.f32.mrb[14].mxu1  ;;  %v1747_v36 = vpop.f32.mrb[15].mxu0 }
 0x193   : > { %1789 = vst [vmem:[%s3246_s24 + $0x70] sm:$0xff] %v2300_v20  ;;  %v2302_v42 = vadd.f32 %v2285_v14, %v2213_v57  ;;  %v1209_v46 = vpop.f32.mrb[15].mxu1 }
 0x194   : > { %1787 = vst [vmem:[%s3246_s24 + $0x60] sm:$0xff] %v2301_v51  ;;  %v2303_v0 = vadd.f32 %v1747_v36, %v1209_v46 }
 0x195   : > { %1790 = vst [vmem:[%s3246_s24 + $0x78] sm:$0xff] %v2302_v42 }
 0x196   : > { %1788 = vst [vmem:[%s3246_s24 + $0x68] sm:$0xff] %v2303_v0 }
 0x197   : > { %2523 = shalt.err (!%p2520_p6)
}
 0x198   : > { %s2524_s17 = scalar_lea.hbm %s3267_s3, 2048  ;;  %s2528_s24 = scalar_lea.hbm %s3330_s2, 8192 }
 0x199   : > { %p2525_p7 = scmp.ne.s32.totalorder %s3267_s3, %s2524_s17  ;;  %p2529_p11 = scmp.lt.u32.totalorder %s3267_s3, %s3330_s2 }
 0x19a   : > { %p2530_p12 = scmp.lt.u32.totalorder %s2528_s24, %s2524_s17  ;;  %p2532_p0 = scmp.lt.u32.totalorder %s2524_s17, %s3267_s3 }
 0x19b   : > { %p2526_p9 = pnand %p2525_p7, %p2675_p3 }
 0x19c   : > { %p2531_p13 = por %p2530_p12, %p2529_p11 }
 0x19d   : > { %p2527_p10 = pneg %p2526_p9 }
 0x19e   : > { %p2533_p1 = por %p2532_p0, %p2531_p13 }
 0x1a0   : > { %p2534_p2 = pnand %p2533_p1, %p2527_p10 }
 0x1a2   : > { %2537 = shalt.err (!%p2534_p2)
}
 0x1a3   : > { %s2607_s28 = smov 128   ;;  %s2608_s29 = smov 8  }
 0x1a4   : > { %2427 = dma.vmem_to_hbm [thread:$0]  (%p2675_p3), %s3269_s30, 2048, %s3267_s3, %s3276_s4, %s2607_s28, %s2607_s28, %s2608_s29  }
 0x1a5 PF: > { %p2433_p4 = scmp.ge.s32.totalorder %s2604_s16, 2  ;;  %s1823_s12 = sand.u32 1, %s2576_s9  }
 0x1a6   : > { %s1824_s13 = scalar_lea.sflag [#allocation3], %s1823_s12 }
 0x1a7   : > { %p2430_p5 = pnand %p2433_p4, %p2684_p8 }
 0x1a9   : > { %2571 = dma.done.wait (!%p2430_p5), %s1824_s13, 2048  }
 0x1aa   : > { %2573 = vsyncadd (!%p2430_p5), %s1824_s13, 4294965248  ;;  %s15_s16 = sadd.s32 1, %s2604_s16   ;;  %s3337_s9 = smov %s2580_s10 }
 0x1ab   : > { %p12_p6 = scmp.ge.s32.totalorder %s15_s16, 6   ;;  %s3338_s10 = smov %s2584_s11 }
 0x1ac   : > { %s3339_s11 = smov %s2693_s27  ;;  %s3340_s12 = smov %s2596_s14 }
 0x1ad   : > { %s3341_s13 = smov %s2600_s15  ;;  %s3342_s14 = smov %s3345_s19 }
 0x1ae   : > { %s3343_s15 = smov %s3349_s20  ;;  %14 = sbr.rel (!%p12_p6) target bundleno = 5 (0x5), region = 75 }
 0x1b5   :  { %1829 = vsyncpa [#allocation3], 1 }
 0x1b6   :  { %1831 = vsyncpa [#allocation3 + $0x1], 1 }

</bundles_post_ra>
